<compile_context>
chip_gen: v5e
topology: v5e:2x2
jax: 0.10.0
libtpu: 0.0.40
codegen_flags: <defaults>
</compile_context>

<pallas_src>
import jax
import jax.numpy as jnp
from jax.experimental import pallas as pl
from jax.experimental.pallas import tpu as pltpu


_DIMS = (8, 6, 4, 2, 1)          # layer widths: 8 -> 6 -> 4 -> 2 -> 1
_NLAYERS = len(_DIMS) - 1        # 4
_PAD = 8                         # pad every layer to 8x8 (one f32 sublane tile)


def _mlp_kernel(x_ref, w_ref, b_ref, o_ref):
    """Batch-in-lanes MLP tile.

    x_ref : (8, TB)   activations; features on sublanes, batch on lanes
    w_ref : (4, 8, 8) zero-padded (out, in) weights, VMEM-resident across steps
    b_ref : (4, 8, 1) zero-padded biases
    o_ref : (1, TB)   lane-dense output (row 0 of the padded activation)

    Zero padding keeps the math exact: padded output rows become sigmoid(0)=0.5
    but the next layer's padded weight columns are zero, so they never leak in.
    """
    h = x_ref[...]                                    # (8, TB) f32
    for i in range(_NLAYERS):                         # unrolled at trace time
        h = jax.nn.sigmoid(
            jnp.dot(w_ref[i], h, preferred_element_type=jnp.float32)
            + b_ref[i])                               # (8,1) bias, lane-broadcast
    o_ref[...] = h[0:1, :].astype(o_ref.dtype)


def pack_params(params):
    """Pack the 4 (out,in) weights / biases into one padded blob each."""
    wpack = jnp.zeros((_NLAYERS, _PAD, _PAD), jnp.float32)
    bpack = jnp.zeros((_NLAYERS, _PAD, 1), jnp.float32)
    for i in range(_NLAYERS):
        din, dout = _DIMS[i], _DIMS[i + 1]
        wpack = wpack.at[i, :dout, :din].set(params[f"w{i + 1}"])
        bpack = bpack.at[i, :dout, 0].set(params[f"b{i + 1}"])
    return wpack, bpack


def mlp_forward(x, params, tb=1024):
    """x: (B, 8) float32 (PyTorch layout). Returns (B, 1) float32."""
    B = x.shape[0]
    # Batch lives on the lane axis -> tile must be a multiple of 128.
    tb = max(128, min(tb, pl.cdiv(B, 128) * 128))
    b_pad = pl.cdiv(B, tb) * tb
    grid = (b_pad // tb,)

    # Layout plumbing (outside the kernel): batch -> lanes, features -> sublanes.
    xt = jnp.pad(x.T, ((0, 0), (0, b_pad - B)))       # (8, b_pad)
    wpack, bpack = pack_params(params)

    out = pl.pallas_call(
        _mlp_kernel,
        out_shape=jax.ShapeDtypeStruct((1, b_pad), jnp.float32),
        grid=grid,
        in_specs=[
            pl.BlockSpec((8, tb), lambda i: (0, i)),                    # streamed
            pl.BlockSpec((_NLAYERS, _PAD, _PAD), lambda i: (0, 0, 0)),  # resident
            pl.BlockSpec((_NLAYERS, _PAD, 1), lambda i: (0, 0, 0)),     # resident
        ],
        out_specs=pl.BlockSpec((1, tb), lambda i: (0, i)),
        compiler_params=pltpu.CompilerParams(
            dimension_semantics=("parallel",)),       # megacore shard on v7x
    )(xt, wpack, bpack)

    return out[:, :B].T                               # back to (B, 1)


def init_params(key):
    """Deterministic init matching torch.nn.Linear (weight (out,in), bias (out,))."""
    params = {}
    for i, (din, dout) in enumerate(zip(_DIMS[:-1], _DIMS[1:]), start=1):
        key, kw, kb = jax.random.split(key, 3)
        bound = 1.0 / float(din) ** 0.5
        params[f"w{i}"] = jax.random.uniform(
            kw, (dout, din), jnp.float32, minval=-bound, maxval=bound)
        params[f"b{i}"] = jax.random.uniform(
            kb, (dout,), jnp.float32, minval=-bound, maxval=bound)
    return params


def mlp_reference(x, params):
    h = x
    for i in range(1, _NLAYERS + 1):
        h = jax.nn.sigmoid(h @ params[f"w{i}"].T + params[f"b{i}"])
    return h


if __name__ == "__main__":
    key = jax.random.PRNGKey(0)
    kparams, kx = jax.random.split(key)
    params = init_params(kparams)

    B = 300  # non-multiple of 128 to exercise the pad / slice path
    x = jax.random.normal(kx, (B, 8), jnp.float32)

    y = jax.block_until_ready(mlp_forward(x, params, tb=512))
    y_ref = mlp_reference(x, params)

    assert y.shape == (B, 1)
    assert jnp.allclose(y, y_ref, atol=1e-5, rtol=1e-5)
    print("KERNEL_OK")
</pallas_src>

<mosaic_0001>
module attributes {stable_mosaic.version = 11 : i64} {
  func.func @_mlp_kernel(%arg0: i32, %arg1: memref<8x384xf32, #tpu.memory_space<vmem>>, %arg2: memref<4x8x8xf32, #tpu.memory_space<vmem>>, %arg3: memref<4x8x1xf32, #tpu.memory_space<vmem>>, %arg4: memref<1x384xf32, #tpu.memory_space<vmem>>) attributes {dimension_semantics = [#tpu.dimension_semantics<parallel>], iteration_bounds = array<i64: 1>, scalar_prefetch = 0 : i64, scratch_operands = 0 : i64, tpu.core_type = #tpu.core_type<tc>, window_params = [{transform_indices = @transform_0, window_bounds = array<i64: 8, 384>}, {pipeline_mode = #tpu.pipeline_mode<synchronous>, transform_indices = @transform_1, window_bounds = array<i64: 4, 8, 8>}, {pipeline_mode = #tpu.pipeline_mode<synchronous>, transform_indices = @transform_2, window_bounds = array<i64: 4, 8, 1>}, {transform_indices = @transform_3, window_bounds = array<i64: 1, 384>}]} {
    %c0 = arith.constant 0 : index
    %c0_0 = arith.constant 0 : index
    %0 = vector.load %arg1[%c0, %c0_0] : memref<8x384xf32, #tpu.memory_space<vmem>>, vector<8x384xf32>
    %c0_1 = arith.constant 0 : index
    %c0_2 = arith.constant 0 : index
    %c0_3 = arith.constant 0 : index
    %1 = vector.load %arg2[%c0_1, %c0_2, %c0_3] : memref<4x8x8xf32, #tpu.memory_space<vmem>>, vector<1x8x8xf32>
    %2 = vector.shape_cast %1 : vector<1x8x8xf32> to vector<8x8xf32>
    %cst = arith.constant dense<0.000000e+00> : vector<8x384xf32>
    %3 = tpu.matmul %2, %0, %cst {dimension_numbers = #tpu.dot_dimension_numbers<[1], [0], [0], [1], [0, 0, 1, 1], [], []>} : vector<8x8xf32>, vector<8x384xf32>, vector<8x384xf32> -> vector<8x384xf32>
    %c0_4 = arith.constant 0 : index
    %c0_5 = arith.constant 0 : index
    %c0_6 = arith.constant 0 : index
    %4 = vector.load %arg3[%c0_4, %c0_5, %c0_6] : memref<4x8x1xf32, #tpu.memory_space<vmem>>, vector<1x8x1xf32>
    %5 = vector.shape_cast %4 : vector<1x8x1xf32> to vector<8x1xf32>
    %6 = vector.broadcast %5 : vector<8x1xf32> to vector<8x384xf32>
    %7 = arith.addf %3, %6 : vector<8x384xf32>
    %8 = arith.negf %7 : vector<8x384xf32>
    %9 = math.exp %8 : vector<8x384xf32>
    %cst_7 = arith.constant 1.000000e+00 : f32
    %10 = vector.broadcast %cst_7 : f32 to vector<8x384xf32>
    %11 = arith.addf %10, %9 : vector<8x384xf32>
    %12 = arith.divf %10, %11 : vector<8x384xf32>
    %c1 = arith.constant 1 : index
    %c0_8 = arith.constant 0 : index
    %c0_9 = arith.constant 0 : index
    %13 = vector.load %arg2[%c1, %c0_8, %c0_9] : memref<4x8x8xf32, #tpu.memory_space<vmem>>, vector<1x8x8xf32>
    %14 = vector.shape_cast %13 : vector<1x8x8xf32> to vector<8x8xf32>
    %cst_10 = arith.constant dense<0.000000e+00> : vector<8x384xf32>
    %15 = tpu.matmul %14, %12, %cst_10 {dimension_numbers = #tpu.dot_dimension_numbers<[1], [0], [0], [1], [0, 0, 1, 1], [], []>} : vector<8x8xf32>, vector<8x384xf32>, vector<8x384xf32> -> vector<8x384xf32>
    %c1_11 = arith.constant 1 : index
    %c0_12 = arith.constant 0 : index
    %c0_13 = arith.constant 0 : index
    %16 = vector.load %arg3[%c1_11, %c0_12, %c0_13] : memref<4x8x1xf32, #tpu.memory_space<vmem>>, vector<1x8x1xf32>
    %17 = vector.shape_cast %16 : vector<1x8x1xf32> to vector<8x1xf32>
    %18 = vector.broadcast %17 : vector<8x1xf32> to vector<8x384xf32>
    %19 = arith.addf %15, %18 : vector<8x384xf32>
    %20 = arith.negf %19 : vector<8x384xf32>
    %21 = math.exp %20 : vector<8x384xf32>
    %cst_14 = arith.constant 1.000000e+00 : f32
    %22 = vector.broadcast %cst_14 : f32 to vector<8x384xf32>
    %23 = arith.addf %22, %21 : vector<8x384xf32>
    %24 = arith.divf %22, %23 : vector<8x384xf32>
    %c2 = arith.constant 2 : index
    %c0_15 = arith.constant 0 : index
    %c0_16 = arith.constant 0 : index
    %25 = vector.load %arg2[%c2, %c0_15, %c0_16] : memref<4x8x8xf32, #tpu.memory_space<vmem>>, vector<1x8x8xf32>
    %26 = vector.shape_cast %25 : vector<1x8x8xf32> to vector<8x8xf32>
    %cst_17 = arith.constant dense<0.000000e+00> : vector<8x384xf32>
    %27 = tpu.matmul %26, %24, %cst_17 {dimension_numbers = #tpu.dot_dimension_numbers<[1], [0], [0], [1], [0, 0, 1, 1], [], []>} : vector<8x8xf32>, vector<8x384xf32>, vector<8x384xf32> -> vector<8x384xf32>
    %c2_18 = arith.constant 2 : index
    %c0_19 = arith.constant 0 : index
    %c0_20 = arith.constant 0 : index
    %28 = vector.load %arg3[%c2_18, %c0_19, %c0_20] : memref<4x8x1xf32, #tpu.memory_space<vmem>>, vector<1x8x1xf32>
    %29 = vector.shape_cast %28 : vector<1x8x1xf32> to vector<8x1xf32>
    %30 = vector.broadcast %29 : vector<8x1xf32> to vector<8x384xf32>
    %31 = arith.addf %27, %30 : vector<8x384xf32>
    %32 = arith.negf %31 : vector<8x384xf32>
    %33 = math.exp %32 : vector<8x384xf32>
    %cst_21 = arith.constant 1.000000e+00 : f32
    %34 = vector.broadcast %cst_21 : f32 to vector<8x384xf32>
    %35 = arith.addf %34, %33 : vector<8x384xf32>
    %36 = arith.divf %34, %35 : vector<8x384xf32>
    %c3 = arith.constant 3 : index
    %c0_22 = arith.constant 0 : index
    %c0_23 = arith.constant 0 : index
    %37 = vector.load %arg2[%c3, %c0_22, %c0_23] : memref<4x8x8xf32, #tpu.memory_space<vmem>>, vector<1x8x8xf32>
    %38 = vector.shape_cast %37 : vector<1x8x8xf32> to vector<8x8xf32>
    %cst_24 = arith.constant dense<0.000000e+00> : vector<8x384xf32>
    %39 = tpu.matmul %38, %36, %cst_24 {dimension_numbers = #tpu.dot_dimension_numbers<[1], [0], [0], [1], [0, 0, 1, 1], [], []>} : vector<8x8xf32>, vector<8x384xf32>, vector<8x384xf32> -> vector<8x384xf32>
    %c3_25 = arith.constant 3 : index
    %c0_26 = arith.constant 0 : index
    %c0_27 = arith.constant 0 : index
    %40 = vector.load %arg3[%c3_25, %c0_26, %c0_27] : memref<4x8x1xf32, #tpu.memory_space<vmem>>, vector<1x8x1xf32>
    %41 = vector.shape_cast %40 : vector<1x8x1xf32> to vector<8x1xf32>
    %42 = vector.broadcast %41 : vector<8x1xf32> to vector<8x384xf32>
    %43 = arith.addf %39, %42 : vector<8x384xf32>
    %44 = arith.negf %43 : vector<8x384xf32>
    %45 = math.exp %44 : vector<8x384xf32>
    %cst_28 = arith.constant 1.000000e+00 : f32
    %46 = vector.broadcast %cst_28 : f32 to vector<8x384xf32>
    %47 = arith.addf %46, %45 : vector<8x384xf32>
    %48 = arith.divf %46, %47 : vector<8x384xf32>
    %49 = vector.extract_strided_slice %48 {offsets = [0, 0], sizes = [1, 384], strides = [1, 1]} : vector<8x384xf32> to vector<1x384xf32>
    %c0_29 = arith.constant 0 : index
    %c0_30 = arith.constant 0 : index
    %50 = vector.load %arg4[%c0_29, %c0_30] : memref<1x384xf32, #tpu.memory_space<vmem>>, vector<1x384xf32>
    tpu.vector_store %arg4[%c0_29, %c0_30], %49 {strides = array<i32>} : memref<1x384xf32, #tpu.memory_space<vmem>>, vector<1x384xf32>,
    return
  }
  func.func @transform_0(%arg0: i32) -> (i32, i32) {
    %c0_i32 = arith.constant 0 : i32
    %c0_i32_0 = arith.constant 0 : i32
    return %c0_i32, %arg0 : i32, i32
  }
  func.func @transform_1(%arg0: i32) -> (i32, i32, i32) {
    %c0_i32 = arith.constant 0 : i32
    %c0_i32_0 = arith.constant 0 : i32
    %c0_i32_1 = arith.constant 0 : i32
    %c0_i32_2 = arith.constant 0 : i32
    return %c0_i32, %c0_i32_0, %c0_i32_1 : i32, i32, i32
  }
  func.func @transform_2(%arg0: i32) -> (i32, i32, i32) {
    %c0_i32 = arith.constant 0 : i32
    %c0_i32_0 = arith.constant 0 : i32
    %c0_i32_1 = arith.constant 0 : i32
    %c0_i32_2 = arith.constant 0 : i32
    return %c0_i32, %c0_i32_0, %c0_i32_1 : i32, i32, i32
  }
  func.func @transform_3(%arg0: i32) -> (i32, i32) {
    %c0_i32 = arith.constant 0 : i32
    %c0_i32_0 = arith.constant 0 : i32
    return %c0_i32, %arg0 : i32, i32
  }
}

</mosaic_0001>

<bundles_post_ra>
// kernel: tpu_custom_call.1
= control target key start
LH: loop header
LB: loop body
LE: loop exit
PB: predicated region body
PF: predicated region fallthrough
CT: control target
= control target key end

     0   :  { %8 = vsyncpa [#allocation3], 0  ;;  %s787_s0 = inlined_call_operand.hbm [shape: f32[8,384], index: 0, kind: input, shape index: {}]   ;;  %s788_s1 = inlined_call_operand.vmem [shape: f32[4,8,8], index: 1, kind: input, shape index: {}]   ;;  %s789_s2 = inlined_call_operand.vmem [shape: f32[4,8,1], index: 2, kind: input, shape index: {}]   ;;  %s790_s3 = inlined_call_operand.hbm [shape: f32[1,384], index: 3, kind: output, shape index: {}]  }
   0x1   :  { %9 = vsyncpa [#allocation4], 0  ;;  %s15_s14 = sshll.u32 %s787_s0, 4  ;;  %s714_s15 = smov [#allocation2]   ;;  %s16_s14 = int_to_ptr.hbm [resolvable:$true] %s15_s14 }
   0x2   :  { %s17_s16 = sshll.u32 %s714_s15, 4  ;;  %s18_s16 = int_to_ptr.vmem [resolvable:$true] %s17_s16 }
   0x3   :  { %20 = dma.hbm_to_vmem [thread:$0]  %s16_s14, 384, %s18_s16, [#allocation3]  }
   0x4   :  { %710 = dma.done.wait [#allocation3], 384  }
   0x5   :  { %711 = vsyncadd [#allocation3], 4294966912  ;;  %v715_v0 = vmov 0   ;;  %vm39_vm0 = vcmask 64512   ;;  %v29_v1 = vld [vmem:[#allocation2] sm:$0xff]  ;;  %v30_v2 = vld [vmem:[#allocation2 + $0x8] sm:$0xff] }
   0x6   :  { %612 = vset.pattern.permute.xlu0 %v715_v0  ;;  %613 = vset.pattern.permute.xlu1 %v715_v0  ;;  %v31_v3 = vld [vmem:[#allocation2 + $0x10] sm:$0xff]  ;;  %v32_v4 = vld [vmem:[%s788_s1] sm:$0xff]  ;;  %v586_v6 = vld [vmem:[%s789_s2 + $0x8] sm:$0xff]  ;;  %s569_s7 = sshll.u32 %s790_s3, 4  ;;  %s570_s7 = int_to_ptr.hbm [resolvable:$true] %s569_s7 }
   0x7   :  { %58 = vmatpush.msra.mxu0 %v29_v1  ;;  %78 = vmatpush.msra.mxu1 %v30_v2  ;;  %v33_v5 = vld [vmem:[%s789_s2] sm:$0xff]  ;;  %v585_v42 = vld [vmem:[%s788_s1 + $0x8] sm:$0xff]  ;;  %v594_v61 = vld [vmem:[%s789_s2 + $0x10] sm:$0xff] }
   0x8   :  { %98 = vmatpush.msra.mxu2 %v31_v3  ;;  %579 = vmatmul.msk.f32.vlgmr.msra.gmra.mxu0 %vm39_vm0, %v32_v4  ;;  %v602_v3 = vld [vmem:[%s789_s2 + $0x18] sm:$0xff] }
   0x9   :  { %580 = vmatmul.msk.f32.vlgmr.msra.gmra.mxu1 %vm39_vm0, %v32_v4  ;;  %581 = vmatmul.msk.f32.vlgmr.msra.gmra.mxu2 %vm39_vm0, %v32_v4 }
   0xa   :  { %36 = vperm.xlu0 %612, %v33_v5   ;;  %295 = vperm.xlu1 %613, %v594_v61  }
  0x12   :  { %166 = vperm.xlu0 %612, %v586_v6   ;;  %424 = vperm.xlu1 %613, %v602_v3  }
  0x7c   :  { %v37_v7 = vpop.permute.xlu0 %36 }
  0x84   :  { %v167_v54 = vpop.permute.xlu0 %166 }
  0x85   :  { %v60_v8 = vpop.f32.mrf.mxu0 }
  0x86   :  { %v61_v9 = vadd.f32 %v60_v8, %v37_v7  ;;  %v80_v10 = vpop.f32.mrf.mxu1 }
  0x87   :  { %v81_v11 = vadd.f32 %v80_v10, %v37_v7 }
  0x88   :  { %v582_v12 = vmul.f32 -1.442695, %v61_v9 }
  0x89   :  { %v583_v13 = vmul.f32 -1.442695, %v81_v11 }
  0x8a   :  { %614 = vpow2.f32 %v582_v12 }
  0x8b   :  { %616 = vpow2.f32 %v583_v13 }
  0x8c   :  { %v100_v14 = vpop.f32.mrf.mxu2 }
  0x8d   :  { %v101_v15 = vadd.f32 %v100_v14, %v37_v7 }
  0x8f   :  { %v584_v16 = vmul.f32 -1.442695, %v101_v15 }
  0x90   :  { %v615_v17 = vpop.eup %614 }
  0x91   :  { %v617_v18 = vpop.eup %616  ;;  %v112_v19 = vadd.f32 1.0, %v615_v17  ;;  %618 = vpow2.f32 %v584_v16 }
  0x92   :  { %v113_v20 = vadd.f32 1.0, %v617_v18 }
  0x93   :  { %620 = vrcp.f32 %v112_v19  ;;  %v126_v28 = vand.u32 2147483648, %v112_v19  ;;  %v124_v31 = vand.u32 2147483647, %v112_v19  ;;  %vm120_vm3 = vweird.f32 %v112_v19 }
  0x94   :  { %622 = vrcp.f32 %v113_v20  ;;  %v141_v32 = vand.u32 2147483648, %v113_v20  ;;  %v139_v34 = vand.u32 2147483647, %v113_v20  ;;  %vm135_vm5 = vweird.f32 %v113_v20 }
  0x95   :  { %v127_v37 = vor.u32 1.1754944e-38, %v126_v28  ;;  %vm125_vm6 = vcmp.eq.f32.partialorder %v124_v31, 8.507059e+37 }
  0x96   :  { %v142_v41 = vor.u32 1.1754944e-38, %v141_v32  ;;  %vm140_vm8 = vcmp.eq.f32.partialorder %v139_v34, 8.507059e+37 }
  0x97   :  { %v619_v21 = vpop.eup %618 }
  0x98   :  { %v114_v22 = vadd.f32 1.0, %v619_v21 }
  0x99   :  { %v621_v23 = vpop.eup %620 }
  0x9a   :  { %v623_v24 = vpop.eup %622  ;;  %624 = vrcp.f32 %v114_v22  ;;  %v116_v25 = vmul.f32 %v621_v23, %v112_v19  ;;  %vm121_vm1 = vweird.f32 %v621_v23  ;;  %v156_v47 = vand.u32 2147483648, %v114_v22 }
  0x9b   :  { %v131_v26 = vmul.f32 %v623_v24, %v113_v20  ;;  %vm136_vm2 = vweird.f32 %v623_v24  ;;  %vm122_vm4 = vmor %vm120_vm3, %vm121_vm1  ;;  %v154_v49 = vand.u32 2147483647, %v114_v22  ;;  %vm150_vm10 = vweird.f32 %v114_v22 }
  0x9c   :  { %v117_v27 = vsub.f32 1.0, %v116_v25  ;;  %vm137_vm7 = vmor %vm135_vm5, %vm136_vm2  ;;  %v157_v51 = vor.u32 1.1754944e-38, %v156_v47 }
  0x9d   :  { %v132_v29 = vsub.f32 1.0, %v131_v26  ;;  %vm155_vm12 = vcmp.eq.f32.partialorder %v154_v49, 8.507059e+37 }
  0x9e   :  { %v118_v30 = vmul.f32 %v621_v23, %v117_v27 }
  0x9f   :  { %v133_v33 = vmul.f32 %v623_v24, %v132_v29 }
  0xa0   :  { %v625_v35 = vpop.eup %624  ;;  %v119_v36 = vadd.f32 %v621_v23, %v118_v30 }
  0xa1   :  { %v134_v38 = vadd.f32 %v623_v24, %v133_v33  ;;  %v146_v39 = vmul.f32 %v625_v35, %v114_v22  ;;  %vm151_vm9 = vweird.f32 %v625_v35  ;;  %v593_v22 = vld [vmem:[%s788_s1 + $0x10] sm:$0xff] }
  0xa2   :  { %v123_v40 = vsel %vm122_vm4, %v621_v23, %v119_v36  ;;  %vm152_vm11 = vmor %vm150_vm10, %vm151_vm9 }
  0xa3   :  { %v128_v43 = vsel %vm125_vm6, %v127_v37, %v123_v40  ;;  %v138_v44 = vsel %vm137_vm7, %v623_v24, %v134_v38  ;;  %v147_v45 = vsub.f32 1.0, %v146_v39  ;;  %v296_v39 = vpop.permute.xlu1 %295 }
  0xa4   :  { %187 = vmatpush.msra.mxu3 %v128_v43  ;;  %v143_v46 = vsel %vm140_vm8, %v142_v41, %v138_v44 }
  0xa5   :  { %207 = vmatpush.msrb.mxu0 %v143_v46  ;;  %587 = vmatmul.msk.f32.vlgmr.msra.gmra.mxu3 %vm39_vm0, %v585_v42  ;;  %v148_v48 = vmul.f32 %v625_v35, %v147_v45 }
  0xa6   :  { %588 = vmatmul.msk.f32.vlgmr.msrb.gmra.mxu0 %vm39_vm0, %v585_v42 }
  0xa7   :  { %v149_v50 = vadd.f32 %v625_v35, %v148_v48 }
  0xa9   :  { %v153_v52 = vsel %vm152_vm11, %v625_v35, %v149_v50 }
  0xaa   :  { %v158_v53 = vsel %vm155_vm12, %v157_v51, %v153_v52 }
  0xab   :  { %227 = vmatpush.msrb.mxu1 %v158_v53 }
  0xac   :  { %589 = vmatmul.msk.f32.vlgmr.msrb.gmra.mxu1 %vm39_vm0, %v585_v42 }
 0x123   :  { %v209_v55 = vpop.f32.mrf.mxu0 }
 0x124   :  { %v210_v56 = vadd.f32 %v209_v55, %v167_v54 }
 0x126   :  { %v591_v57 = vmul.f32 -1.442695, %v210_v56 }
 0x128   :  { %626 = vpow2.f32 %v591_v57  ;;  %v189_v58 = vpop.f32.mrf.mxu3 }
 0x129   :  { %v190_v59 = vadd.f32 %v189_v58, %v167_v54  ;;  %v229_v60 = vpop.f32.mrf.mxu1 }
 0x12a   :  { %v230_v62 = vadd.f32 %v229_v60, %v167_v54 }
 0x12b   :  { %v590_v63 = vmul.f32 -1.442695, %v190_v59 }
 0x12c   :  { %v592_v0 = vmul.f32 -1.442695, %v230_v62 }
 0x12d   :  { %628 = vpow2.f32 %v590_v63 }
 0x12e   :  { %v627_v1 = vpop.eup %626  ;;  %630 = vpow2.f32 %v592_v0 }
 0x12f   :  { %v242_v2 = vadd.f32 1.0, %v627_v1 }
 0x131   :  { %632 = vrcp.f32 %v242_v2  ;;  %v268_v11 = vand.u32 2147483647, %v242_v2  ;;  %v270_v12 = vand.u32 2147483648, %v242_v2  ;;  %vm264_vm14 = vweird.f32 %v242_v2 }
 0x133   :  { %v629_v4 = vpop.eup %628  ;;  %vm269_vm1 = vcmp.eq.f32.partialorder %v268_v11, 8.507059e+37  ;;  %v271_v19 = vor.u32 1.1754944e-38, %v270_v12  ;;  %v601_v11 = vld [vmem:[%s788_s1 + $0x18] sm:$0xff]  ;;  %s716_s1 = smov [#allocation5]  }
 0x134   :  { %v631_v5 = vpop.eup %630  ;;  %v241_v6 = vadd.f32 1.0, %v629_v4  ;;  %s567_s4 = sshll.u32 %s716_s1, 4  ;;  %s568_s4 = int_to_ptr.vmem [resolvable:$true] %s567_s4 }
 0x135   :  { %v243_v7 = vadd.f32 1.0, %v631_v5 }
 0x136   :  { %634 = vrcp.f32 %v241_v6  ;;  %v253_v23 = vand.u32 2147483647, %v241_v6  ;;  %v255_v24 = vand.u32 2147483648, %v241_v6  ;;  %vm249_vm4 = vweird.f32 %v241_v6 }
 0x137   :  { %v633_v8 = vpop.eup %632  ;;  %636 = vrcp.f32 %v243_v7  ;;  %v285_v28 = vand.u32 2147483648, %v243_v7  ;;  %v283_v30 = vand.u32 2147483647, %v243_v7  ;;  %vm279_vm6 = vweird.f32 %v243_v7 }
 0x138   :  { %v260_v9 = vmul.f32 %v633_v8, %v242_v2  ;;  %vm265_vm13 = vweird.f32 %v633_v8  ;;  %v256_v32 = vor.u32 1.1754944e-38, %v255_v24  ;;  %vm254_vm7 = vcmp.eq.f32.partialorder %v253_v23, 8.507059e+37 }
 0x139   :  { %vm266_vm15 = vmor %vm264_vm14, %vm265_vm13  ;;  %v286_v35 = vor.u32 1.1754944e-38, %v285_v28  ;;  %vm284_vm9 = vcmp.eq.f32.partialorder %v283_v30, 8.507059e+37 }
 0x13a   :  { %v261_v10 = vsub.f32 1.0, %v260_v9 }
 0x13c   :  { %v635_v13 = vpop.eup %634  ;;  %v262_v14 = vmul.f32 %v633_v8, %v261_v10 }
 0x13d   :  { %v637_v15 = vpop.eup %636  ;;  %v245_v16 = vmul.f32 %v635_v13, %v241_v6  ;;  %vm250_vm2 = vweird.f32 %v635_v13 }
 0x13e   :  { %v263_v17 = vadd.f32 %v633_v8, %v262_v14  ;;  %v275_v18 = vmul.f32 %v637_v15, %v243_v7  ;;  %vm280_vm3 = vweird.f32 %v637_v15  ;;  %vm251_vm5 = vmor %vm249_vm4, %vm250_vm2 }
 0x13f   :  { %v246_v20 = vsub.f32 1.0, %v245_v16  ;;  %vm281_vm8 = vmor %vm279_vm6, %vm280_vm3 }
 0x140   :  { %v267_v21 = vsel %vm266_vm15, %v633_v8, %v263_v17  ;;  %v276_v25 = vsub.f32 1.0, %v275_v18 }
 0x141   :  { %v272_v26 = vsel %vm269_vm1, %v271_v19, %v267_v21  ;;  %v247_v27 = vmul.f32 %v635_v13, %v246_v20 }
 0x142   :  { %336 = vmatpush.msrb.mxu3 %v272_v26  ;;  %v277_v29 = vmul.f32 %v637_v15, %v276_v25 }
 0x143   :  { %596 = vmatmul.msk.f32.vlgmr.msrb.gmra.mxu3 %vm39_vm0, %v593_v22  ;;  %v248_v31 = vadd.f32 %v635_v13, %v247_v27 }
 0x144   :  { %v278_v33 = vadd.f32 %v637_v15, %v277_v29 }
 0x145   :  { %v252_v34 = vsel %vm251_vm5, %v635_v13, %v248_v31 }
 0x146   :  { %v257_v36 = vsel %vm254_vm7, %v256_v32, %v252_v34  ;;  %v282_v37 = vsel %vm281_vm8, %v637_v15, %v278_v33 }
 0x147   :  { %316 = vmatpush.msrb.mxu2 %v257_v36  ;;  %v287_v38 = vsel %vm284_vm9, %v286_v35, %v282_v37 }
 0x148   :  { %356 = vmatpush.msra.mxu0 %v287_v38  ;;  %595 = vmatmul.msk.f32.vlgmr.msrb.gmra.mxu2 %vm39_vm0, %v593_v22 }
 0x149   :  { %597 = vmatmul.msk.f32.vlgmr.msra.gmra.mxu0 %vm39_vm0, %v593_v22  ;;  %v425_v22 = vpop.permute.xlu1 %424 }
 0x1c6   :  { %v338_v40 = vpop.f32.mrf.mxu3  ;;  %v358_v41 = vpop.f32.mrf.mxu0 }
 0x1c7   :  { %v339_v42 = vadd.f32 %v338_v40, %v296_v39  ;;  %v359_v43 = vadd.f32 %v358_v41, %v296_v39 }
 0x1c9   :  { %v599_v44 = vmul.f32 -1.442695, %v339_v42  ;;  %v600_v45 = vmul.f32 -1.442695, %v359_v43 }
 0x1cb   :  { %638 = vpow2.f32 %v599_v44  ;;  %v318_v46 = vpop.f32.mrf.mxu2 }
 0x1cc   :  { %640 = vpow2.f32 %v600_v45  ;;  %v319_v47 = vadd.f32 %v318_v46, %v296_v39 }
 0x1ce   :  { %v598_v48 = vmul.f32 -1.442695, %v319_v47 }
 0x1d0   :  { %642 = vpow2.f32 %v598_v48 }
 0x1d1   :  { %v639_v49 = vpop.eup %638 }
 0x1d2   :  { %v641_v50 = vpop.eup %640  ;;  %v371_v51 = vadd.f32 1.0, %v639_v49 }
 0x1d3   :  { %v372_v52 = vadd.f32 1.0, %v641_v50 }
 0x1d4   :  { %644 = vrcp.f32 %v371_v51  ;;  %v397_v60 = vand.u32 2147483647, %v371_v51  ;;  %v399_v61 = vand.u32 2147483648, %v371_v51  ;;  %vm393_vm12 = vweird.f32 %v371_v51 }
 0x1d5   :  { %646 = vrcp.f32 %v372_v52  ;;  %v412_v63 = vand.u32 2147483647, %v372_v52  ;;  %v414_v2 = vand.u32 2147483648, %v372_v52  ;;  %vm408_vm14 = vweird.f32 %v372_v52 }
 0x1d6   :  { %v643_v53 = vpop.eup %642  ;;  %vm398_vm13 = vcmp.eq.f32.partialorder %v397_v60, 8.507059e+37  ;;  %v400_v6 = vor.u32 1.1754944e-38, %v399_v61  ;;  %v557_v61 = vlaneseq }
 0x1d7   :  { %v370_v54 = vadd.f32 1.0, %v643_v53  ;;  %vm413_vm1 = vcmp.eq.f32.partialorder %v412_v63, 8.507059e+37  ;;  %v415_v10 = vor.u32 1.1754944e-38, %v414_v2 }
 0x1d9   :  { %648 = vrcp.f32 %v370_v54  ;;  %v382_v12 = vand.u32 2147483647, %v370_v54  ;;  %v384_v13 = vand.u32 2147483648, %v370_v54  ;;  %vm378_vm4 = vweird.f32 %v370_v54 }
 0x1da   :  { %v645_v55 = vpop.eup %644 }
 0x1db   :  { %v647_v56 = vpop.eup %646  ;;  %v389_v57 = vmul.f32 %v645_v55, %v371_v51  ;;  %vm394_vm10 = vweird.f32 %v645_v55  ;;  %v385_v19 = vor.u32 1.1754944e-38, %v384_v13  ;;  %vm383_vm6 = vcmp.eq.f32.partialorder %v382_v12, 8.507059e+37 }
 0x1dc   :  { %v404_v58 = vmul.f32 %v647_v56, %v372_v52  ;;  %vm409_vm11 = vweird.f32 %v647_v56  ;;  %vm395_vm15 = vmor %vm393_vm12, %vm394_vm10  ;;  %vm552_vm12 = vcmask 1040384  }
 0x1dd   :  { %v390_v59 = vsub.f32 1.0, %v389_v57  ;;  %vm410_vm2 = vmor %vm408_vm14, %vm409_vm11 }
 0x1de   :  { %v405_v62 = vsub.f32 1.0, %v404_v58 }
 0x1df   :  { %v649_v0 = vpop.eup %648  ;;  %v391_v1 = vmul.f32 %v645_v55, %v390_v59 }
 0x1e0   :  { %v406_v3 = vmul.f32 %v647_v56, %v405_v62  ;;  %v374_v4 = vmul.f32 %v649_v0, %v370_v54  ;;  %vm379_vm3 = vweird.f32 %v649_v0 }
 0x1e1   :  { %v392_v5 = vadd.f32 %v645_v55, %v391_v1  ;;  %vm380_vm5 = vmor %vm378_vm4, %vm379_vm3  ;;  %vm554_vm4 = vcmask 1041408  }
 0x1e2   :  { %v407_v7 = vadd.f32 %v647_v56, %v406_v3  ;;  %v375_v8 = vsub.f32 1.0, %v374_v4 }
 0x1e3   :  { %v396_v9 = vsel %vm395_vm15, %v645_v55, %v392_v5 }
 0x1e4   :  { %v401_v14 = vsel %vm398_vm13, %v400_v6, %v396_v9  ;;  %v411_v15 = vsel %vm410_vm2, %v647_v56, %v407_v7  ;;  %v376_v16 = vmul.f32 %v649_v0, %v375_v8 }
 0x1e5   :  { %465 = vmatpush.msra.mxu2 %v401_v14  ;;  %v416_v17 = vsel %vm413_vm1, %v415_v10, %v411_v15 }
 0x1e6   :  { %485 = vmatpush.msra.mxu3 %v416_v17  ;;  %604 = vmatmul.msk.f32.vlgmr.msra.gmra.mxu2 %vm39_vm0, %v601_v11  ;;  %v377_v18 = vadd.f32 %v649_v0, %v376_v16 }
 0x1e7   :  { %605 = vmatmul.msk.f32.vlgmr.msra.gmra.mxu3 %vm39_vm0, %v601_v11 }
 0x1e8   :  { %v381_v20 = vsel %vm380_vm5, %v649_v0, %v377_v18  ;;  %vm559_vm5 = vcmp.lt.s32.totalorder %v557_v61, 384 }
 0x1e9   :  { %v386_v21 = vsel %vm383_vm6, %v385_v19, %v381_v20 }
 0x1ea   :  { %445 = vmatpush.msra.mxu1 %v386_v21 }
 0x1eb   :  { %603 = vmatmul.msk.f32.vlgmr.msra.gmra.mxu1 %vm39_vm0, %v601_v11 }
 0x268   :  { %v447_v23 = vpop.f32.mrf.mxu1 }
 0x269   :  { %v448_v24 = vadd.f32 %v447_v23, %v425_v22  ;;  %v467_v25 = vpop.f32.mrf.mxu2 }
 0x26a   :  { %v468_v26 = vadd.f32 %v467_v25, %v425_v22  ;;  %v487_v27 = vpop.f32.mrf.mxu3 }
 0x26b   :  { %v606_v28 = vmul.f32 -1.442695, %v448_v24  ;;  %v488_v29 = vadd.f32 %v487_v27, %v425_v22 }
 0x26c   :  { %v607_v30 = vmul.f32 -1.442695, %v468_v26 }
 0x26d   :  { %650 = vpow2.f32 %v606_v28  ;;  %v608_v31 = vmul.f32 -1.442695, %v488_v29 }
 0x26e   :  { %652 = vpow2.f32 %v607_v30 }
 0x26f   :  { %654 = vpow2.f32 %v608_v31 }
 0x273   :  { %v651_v32 = vpop.eup %650 }
 0x274   :  { %v653_v33 = vpop.eup %652  ;;  %v499_v34 = vadd.f32 1.0, %v651_v32 }
 0x275   :  { %v655_v35 = vpop.eup %654  ;;  %v500_v36 = vadd.f32 1.0, %v653_v33 }
 0x276   :  { %656 = vrcp.f32 %v499_v34  ;;  %v501_v37 = vadd.f32 1.0, %v655_v35  ;;  %vm507_vm0 = vweird.f32 %v499_v34  ;;  %v513_v49 = vand.u32 2147483648, %v499_v34 }
 0x277   :  { %658 = vrcp.f32 %v500_v36  ;;  %v528_v46 = vand.u32 2147483648, %v500_v36  ;;  %v526_v51 = vand.u32 2147483647, %v500_v36  ;;  %vm522_vm10 = vweird.f32 %v500_v36 }
 0x278   :  { %660 = vrcp.f32 %v501_v37  ;;  %v543_v52 = vand.u32 2147483648, %v501_v37  ;;  %v541_v55 = vand.u32 2147483647, %v501_v37  ;;  %v511_v57 = vand.u32 2147483647, %v499_v34 }
 0x279   :  { %v529_v59 = vor.u32 1.1754944e-38, %v528_v46  ;;  %vm537_vm14 = vweird.f32 %v501_v37  ;;  %vm527_vm15 = vcmp.eq.f32.partialorder %v526_v51, 8.507059e+37  ;;  %v514_v1 = vor.u32 1.1754944e-38, %v513_v49 }
 0x27a   :  { %v544_v0 = vor.u32 1.1754944e-38, %v543_v52  ;;  %vm542_vm2 = vcmp.eq.f32.partialorder %v541_v55, 8.507059e+37  ;;  %vm512_vm3 = vcmp.eq.f32.partialorder %v511_v57, 8.507059e+37 }
 0x27c   :  { %v657_v38 = vpop.eup %656 }
 0x27d   :  { %v659_v39 = vpop.eup %658  ;;  %v503_v40 = vmul.f32 %v657_v38, %v499_v34  ;;  %vm508_vm7 = vweird.f32 %v657_v38 }
 0x27e   :  { %v661_v41 = vpop.eup %660  ;;  %v518_v42 = vmul.f32 %v659_v39, %v500_v36  ;;  %vm523_vm8 = vweird.f32 %v659_v39  ;;  %vm776_vm11 = vmor %vm507_vm0, %vm508_vm7 }
 0x27f   :  { %v504_v43 = vsub.f32 1.0, %v503_v40  ;;  %v533_v44 = vmul.f32 %v661_v41, %v501_v37  ;;  %vm538_vm9 = vweird.f32 %v661_v41  ;;  %vm524_vm13 = vmor %vm522_vm10, %vm523_vm8 }
 0x280   :  { %v519_v45 = vsub.f32 1.0, %v518_v42  ;;  %vm539_vm1 = vmor %vm537_vm14, %vm538_vm9 }
 0x281   :  { %v505_v47 = vmul.f32 %v657_v38, %v504_v43  ;;  %v534_v48 = vsub.f32 1.0, %v533_v44 }
 0x282   :  { %v520_v50 = vmul.f32 %v659_v39, %v519_v45 }
 0x283   :  { %v535_v53 = vmul.f32 %v661_v41, %v534_v48  ;;  %v506_v54 = vadd.f32 %v657_v38, %v505_v47 }
 0x284   :  { %v521_v58 = vadd.f32 %v659_v39, %v520_v50 }
 0x285   :  { %v536_v60 = vadd.f32 %v661_v41, %v535_v53  ;;  %v510_v62 = vsel %vm776_vm11, %v657_v38, %v506_v54 }
 0x286   :  { %v525_v63 = vsel %vm524_vm13, %v659_v39, %v521_v58  ;;  %v515_v6 = vsel %vm512_vm3, %v514_v1, %v510_v62 }
 0x287   :  { %v530_v2 = vsel %vm527_vm15, %v529_v59, %v525_v63  ;;  %v540_v3 = vsel %vm539_vm1, %v661_v41, %v536_v60 }
 0x288   :  { %v545_v4 = vsel %vm542_vm2, %v544_v0, %v540_v3  ;;  %v550_v5 = vrot.slane %v530_v2, 7 }
 0x289   :  { %v551_v7 = vrot.slane %v545_v4, 6 }
 0x28a   :  { %v553_v8 = vsel %vm552_vm12, %v515_v6, %v550_v5 }
 0x28b   :  { %v555_v9 = vsel %vm554_vm4, %v553_v8, %v551_v7 }
 0x28c   :  { %561 = vst.msk [vmem:[#allocation5] sm:$0x7] %vm559_vm5, %v555_v9 }
 0x28d   :  { %572 = dma.vmem_to_hbm [thread:$0]  %s568_s4, 48, %s570_s7, [#allocation4]  }
 0x28e   :  { %712 = dma.done.wait [#allocation4], 48  }
 0x28f   :  { %713 = vsyncadd [#allocation4], 4294967248 }
 0x290   :  { %577 = vsyncpa [#allocation3], 1 }
 0x291   :  { %578 = vsyncpa [#allocation4], 1 }

</bundles_post_ra>
